<compile_context>
chip_gen: v7x
topology: tpu7x:2x2x1
jax: 0.10.0
libtpu: 0.0.40
codegen_flags: <defaults>
</compile_context>

<pallas_src>
import jax
import jax.numpy as jnp
from jax.experimental import pallas as pl
from jax.experimental.pallas import tpu as pltpu


def mrn_kernel(x_ref, w_ref, b_ref, o_ref):
    C = o_ref.shape[-1]

    x = x_ref[...]            # [bB, 2C]  = [x0 | x1]
    w = w_ref[...]            # [2C, 4C]  = [[W1t,  0,   0,  W2t],
                              #              [ 0,  W3t, W4t,  0 ]]
    b = b_ref[...]            # [1, 4C]   = [b1 | b3 | b4 | b2]

    # One fused MXU push for all three independent linears.
    # (cols 3C:4C of z are x0 @ W2^T + b2 -- unused filler in the 128-lane tile)
    z = jnp.dot(x, w, preferred_element_type=jnp.float32) + b      # [bB, 4C]

    hft = jnp.tanh(z[:, : 2 * C])        # one EUP pass covers both tanh paths
    h   = hft[:, :C]                     # tanh(x0 @ W1^T + b1)
    f_t = hft[:, C : 2 * C]              # tanh(x1 @ W3^T + b3)
    lin = z[:, 2 * C : 3 * C]            # x1 @ W4^T + b4

    # Dependent second linear of v_block (W2 lives in lanes 3C:4C of the slab).
    w2 = w[:C, 3 * C :]                  # [C, C]
    b2 = b[:, 3 * C :]                   # [1, C]
    f_v = jnp.tanh(jnp.dot(h, w2, preferred_element_type=jnp.float32) + b2)

    o_ref[...] = (f_v * f_t + lin).astype(o_ref.dtype)


def pack_params(params, dtype=jnp.float32):
    """Pack the four (W, b) pairs (PyTorch layout W=[out,in]) into one weight
    slab [2C, 4C] and one bias row [1, 4C].  Do once per parameter set."""
    w1, b1 = params["v1"]
    w2, b2 = params["v2"]
    w3, b3 = params["t"]
    w4, b4 = params["tl"]
    C = w1.shape[0]
    wpack = jnp.zeros((2 * C, 4 * C), dtype)
    wpack = wpack.at[:C, 0 * C : 1 * C].set(w1.T.astype(dtype))   # x0 -> pre-h
    wpack = wpack.at[C:, 1 * C : 2 * C].set(w3.T.astype(dtype))   # x1 -> pre-f_t
    wpack = wpack.at[C:, 2 * C : 3 * C].set(w4.T.astype(dtype))   # x1 -> lin
    wpack = wpack.at[:C, 3 * C : 4 * C].set(w2.T.astype(dtype))   # h  -> f_v (2nd dot)
    bpack = jnp.concatenate([b1, b3, b4, b2]).astype(dtype).reshape(1, 4 * C)
    return wpack, bpack


def mrn_composition(x0, x1, params, *, block_b=None):
    """x0, x1: [B, C] float32.  params: dict of (W, b) per linear (PyTorch layout)."""
    B, C = x0.shape
    dtype = x0.dtype

    # ---- glue (outside the kernel): pack params, concat activations ----
    wpack, bpack = pack_params(params, dtype=jnp.float32)
    x = jnp.concatenate([x0, x1], axis=1)                 # [B, 2C]

    if block_b is None:
        block_b = B if B <= 256 else 256                  # batch tile
    assert B % block_b == 0, "wrapper assumes block_b divides B"
    grid = (B // block_b,)

    itemsize = jnp.dtype(jnp.float32).itemsize
    cost = pl.CostEstimate(
        flops=2 * B * (2 * C) * (4 * C) + 2 * B * C * C,
        transcendentals=3 * B * C,
        bytes_accessed=(x.size + wpack.size + bpack.size + B * C) * itemsize,
    )

    return pl.pallas_call(
        mrn_kernel,
        out_shape=jax.ShapeDtypeStruct((B, C), dtype),
        grid=grid,
        in_specs=[
            pl.BlockSpec((block_b, 2 * C), lambda i: (i, 0)),   # activations: batch-tiled
            pl.BlockSpec((2 * C, 4 * C), lambda i: (0, 0)),     # weights: VMEM-resident
            pl.BlockSpec((1, 4 * C), lambda i: (0, 0)),         # biases:  VMEM-resident
        ],
        out_specs=pl.BlockSpec((block_b, C), lambda i: (i, 0)),
        compiler_params=pltpu.CompilerParams(
            # batch axis is independent -> megacore split on v7x at large B.
            # NOTE: if C ever scales to ~1.5-2k, add K/N weight tiling and set
            # vmem_limit_bytes explicitly (v7x has only 64 MiB physical VMEM).
            dimension_semantics=("parallel",),
        ),
        cost_estimate=cost,
    )(x, wpack, bpack)


def _ref(x0, x1, params):
    w1, b1 = params["v1"]
    w2, b2 = params["v2"]
    w3, b3 = params["t"]
    w4, b4 = params["tl"]
    f_v = jnp.tanh(jnp.tanh(x0 @ w1.T + b1) @ w2.T + b2)
    f_t = jnp.tanh(x1 @ w3.T + b3)
    return f_v * f_t + (x1 @ w4.T + b4)


if __name__ == "__main__":
    key = jax.random.PRNGKey(0)
    B, C = 8, 32   # batch=8, in_c=32

    keys = jax.random.split(key, 10)
    x0 = jax.random.normal(keys[0], (B, C), dtype=jnp.float32)
    x1 = jax.random.normal(keys[1], (B, C), dtype=jnp.float32)

    def linear_init(kw, kb):
        # deterministic kaiming-uniform-like init (bound = 1/sqrt(fan_in))
        bound = 1.0 / jnp.sqrt(C)
        w = jax.random.uniform(kw, (C, C), minval=-bound, maxval=bound, dtype=jnp.float32)
        b = jax.random.uniform(kb, (C,), minval=-bound, maxval=bound, dtype=jnp.float32)
        return w, b

    params = {
        "v1": linear_init(keys[2], keys[3]),
        "v2": linear_init(keys[4], keys[5]),
        "t":  linear_init(keys[6], keys[7]),
        "tl": linear_init(keys[8], keys[9]),
    }

    out = jax.block_until_ready(mrn_composition(x0, x1, params))
    ref = _ref(x0, x1, params)

    assert out.shape == (B, C)
    assert jnp.allclose(out, ref, atol=1e-5, rtol=1e-5), "mismatch vs reference"

    print("KERNEL_OK")
</pallas_src>

<mosaic_0001>
module attributes {stable_mosaic.version = 11 : i64} {
  func.func @mrn_kernel(%arg0: i32, %arg1: memref<8x64xf32, #tpu.memory_space<vmem>>, %arg2: memref<64x128xf32, #tpu.memory_space<vmem>>, %arg3: memref<1x128xf32, #tpu.memory_space<vmem>>, %arg4: memref<8x32xf32, #tpu.memory_space<vmem>>) attributes {dimension_semantics = [#tpu.dimension_semantics<parallel>], iteration_bounds = array<i64: 1>, scalar_prefetch = 0 : i64, scratch_operands = 0 : i64, tpu.core_type = #tpu.core_type<tc>, window_params = [{transform_indices = @transform_0, window_bounds = array<i64: 8, 64>}, {pipeline_mode = #tpu.pipeline_mode<synchronous>, transform_indices = @transform_1, window_bounds = array<i64: 64, 128>}, {pipeline_mode = #tpu.pipeline_mode<synchronous>, transform_indices = @transform_2, window_bounds = array<i64: 1, 128>}, {transform_indices = @transform_3, window_bounds = array<i64: 8, 32>}]} {
    %c0 = arith.constant 0 : index
    %c0_0 = arith.constant 0 : index
    %0 = vector.load %arg1[%c0, %c0_0] : memref<8x64xf32, #tpu.memory_space<vmem>>, vector<8x64xf32>
    %c0_1 = arith.constant 0 : index
    %c0_2 = arith.constant 0 : index
    %1 = vector.load %arg2[%c0_1, %c0_2] : memref<64x128xf32, #tpu.memory_space<vmem>>, vector<64x128xf32>
    %c0_3 = arith.constant 0 : index
    %c0_4 = arith.constant 0 : index
    %2 = vector.load %arg3[%c0_3, %c0_4] : memref<1x128xf32, #tpu.memory_space<vmem>>, vector<1x128xf32>
    %cst = arith.constant dense<0.000000e+00> : vector<8x128xf32>
    %3 = tpu.matmul %0, %1, %cst {dimension_numbers = #tpu.dot_dimension_numbers<[1], [0], [0], [1], [0, 0, 1, 1], [], []>} : vector<8x64xf32>, vector<64x128xf32>, vector<8x128xf32> -> vector<8x128xf32>
    %4 = vector.broadcast %2 : vector<1x128xf32> to vector<8x128xf32>
    %5 = arith.addf %3, %4 : vector<8x128xf32>
    %6 = vector.extract_strided_slice %5 {offsets = [0, 0], sizes = [8, 64], strides = [1, 1]} : vector<8x128xf32> to vector<8x64xf32>
    %7 = math.tanh %6 : vector<8x64xf32>
    %8 = vector.extract_strided_slice %7 {offsets = [0, 0], sizes = [8, 32], strides = [1, 1]} : vector<8x64xf32> to vector<8x32xf32>
    %9 = vector.extract_strided_slice %7 {offsets = [0, 32], sizes = [8, 32], strides = [1, 1]} : vector<8x64xf32> to vector<8x32xf32>
    %10 = vector.extract_strided_slice %5 {offsets = [0, 64], sizes = [8, 32], strides = [1, 1]} : vector<8x128xf32> to vector<8x32xf32>
    %11 = vector.extract_strided_slice %1 {offsets = [0, 96], sizes = [32, 32], strides = [1, 1]} : vector<64x128xf32> to vector<32x32xf32>
    %12 = vector.extract_strided_slice %2 {offsets = [0, 96], sizes = [1, 32], strides = [1, 1]} : vector<1x128xf32> to vector<1x32xf32>
    %cst_5 = arith.constant dense<0.000000e+00> : vector<8x32xf32>
    %13 = tpu.matmul %8, %11, %cst_5 {dimension_numbers = #tpu.dot_dimension_numbers<[1], [0], [0], [1], [0, 0, 1, 1], [], []>} : vector<8x32xf32>, vector<32x32xf32>, vector<8x32xf32> -> vector<8x32xf32>
    %14 = vector.broadcast %12 : vector<1x32xf32> to vector<8x32xf32>
    %15 = arith.addf %13, %14 : vector<8x32xf32>
    %16 = math.tanh %15 : vector<8x32xf32>
    %17 = arith.mulf %16, %9 : vector<8x32xf32>
    %18 = arith.addf %17, %10 : vector<8x32xf32>
    %c0_6 = arith.constant 0 : index
    %c0_7 = arith.constant 0 : index
    %19 = vector.load %arg4[%c0_6, %c0_7] : memref<8x32xf32, #tpu.memory_space<vmem>>, vector<8x32xf32>
    tpu.vector_store %arg4[%c0_6, %c0_7], %18 {strides = array<i32>} : memref<8x32xf32, #tpu.memory_space<vmem>>, vector<8x32xf32>,
    return
  }
  func.func @transform_0(%arg0: i32) -> (i32, i32) {
    %c0_i32 = arith.constant 0 : i32
    %c0_i32_0 = arith.constant 0 : i32
    return %arg0, %c0_i32 : i32, i32
  }
  func.func @transform_1(%arg0: i32) -> (i32, i32) {
    %c0_i32 = arith.constant 0 : i32
    %c0_i32_0 = arith.constant 0 : i32
    %c0_i32_1 = arith.constant 0 : i32
    return %c0_i32, %c0_i32_0 : i32, i32
  }
  func.func @transform_2(%arg0: i32) -> (i32, i32) {
    %c0_i32 = arith.constant 0 : i32
    %c0_i32_0 = arith.constant 0 : i32
    %c0_i32_1 = arith.constant 0 : i32
    return %c0_i32, %c0_i32_0 : i32, i32
  }
  func.func @transform_3(%arg0: i32) -> (i32, i32) {
    %c0_i32 = arith.constant 0 : i32
    %c0_i32_0 = arith.constant 0 : i32
    return %arg0, %c0_i32 : i32, i32
  }
}

</mosaic_0001>

<bundles_post_ra>
// kernel: tpu_custom_call.1
= control target key start
LH: loop header
LB: loop body
LE: loop exit
PB: predicated region body
PF: predicated region fallthrough
CT: control target
= control target key end

     0   :  { %8 = vsyncpa [#allocation3], 0  ;;  %s493_s0 = inlined_call_operand.hbm [shape: f32[8,64], index: 0, kind: input, shape index: {}]   ;;  %s494_s1 = inlined_call_operand.hbm [shape: f32[64,128], index: 1, kind: input, shape index: {}]   ;;  %s495_s2 = inlined_call_operand.vmem [shape: f32[1,128], index: 2, kind: input, shape index: {}]   ;;  %s496_s3 = inlined_call_operand.hbm [shape: f32[8,32], index: 3, kind: output, shape index: {}]  }
   0x1   :  { %9 = vsyncpa [#allocation6], 0 }
   0x2   :  { %10 = vsyncpa [#allocation4], 0  ;;  %s414_s12 = smov [#allocation2]   ;;  %s415_s14 = smov [#allocation5]  }
   0x3   :  { %s17_s13 = sshll.u32 %s414_s12, 4  ;;  %s26_s15 = sshll.u32 %s415_s14, 4  ;;  %s18_s13 = int_to_ptr.vmem [resolvable:$true] %s17_s13  ;;  %s445_s15 = int_to_ptr.vmem [resolvable:$true] %s26_s15 }
   0x4   :  { %s342_s18 = scalar_lea.hbm %s493_s0, 128 }
   0x5   :  { %p343_p0 = scmp.ne.s32.totalorder %s493_s0, %s342_s18  ;;  %p346_p1 = scmp.lt.u32.totalorder %s342_s18, %s493_s0 }
   0x7   :  { %p348_p2 = pnand %p346_p1, %p343_p0 }
   0x9   :  { %351 = shalt.err (!%p348_p2)
}
   0xa   :  { %s352_s23 = scalar_lea.vmem %s18_s13, 128  ;;  %p357_p4 = scmp.lt.s32.totalorder %s18_s13, %s18_s13 }
   0xb   :  { %p353_p3 = scmp.ne.s32.totalorder %s18_s13, %s352_s23  ;;  %p358_p5 = scmp.lt.s32.totalorder %s352_s23, %s352_s23 }
   0xd   :  { %p359_p6 = por %p358_p5, %p357_p4 }
   0xf   :  { %p360_p7 = pnand %p359_p6, %p353_p3 }
  0x11   :  { %363 = shalt.err (!%p360_p7)
}
  0x12   :  { %20 = dma.hbm_to_vmem [thread:$0]  %s493_s0, 128, %s18_s13, [#allocation3]  }
  0x13   :  { %s364_s28 = scalar_lea.hbm %s494_s1, 1024 }
  0x14   :  { %p365_p8 = scmp.ne.s32.totalorder %s494_s1, %s364_s28  ;;  %p368_p9 = scmp.lt.u32.totalorder %s364_s28, %s494_s1 }
  0x16   :  { %p370_p10 = pnand %p368_p9, %p365_p8 }
  0x18   :  { %373 = shalt.err (!%p370_p10)
}
  0x19   :  { %s374_s6 = scalar_lea.vmem %s445_s15, 1024  ;;  %p379_p12 = scmp.lt.s32.totalorder %s445_s15, %s445_s15 }
  0x1a   :  { %p375_p11 = scmp.ne.s32.totalorder %s445_s15, %s374_s6  ;;  %p380_p13 = scmp.lt.s32.totalorder %s374_s6, %s374_s6 }
  0x1c   :  { %p381_p0 = por %p380_p13, %p379_p12 }
  0x1e   :  { %p382_p1 = pnand %p381_p0, %p375_p11 }
  0x20   :  { %385 = shalt.err (!%p382_p1)
}
  0x21   :  { %s416_s0 = smov 128   ;;  %s417_s7 = smov 8  }
  0x22   :  { %32 = dma.hbm_to_vmem [thread:$0]  %s494_s1, 1024, %s445_s15, [#allocation6], %s416_s0, %s416_s0, %s417_s7  }
  0x23   :  { %408 = dma.done.wait [#allocation3], 128  }
  0x24   :  { %409 = vsyncadd [#allocation3], 4294967168 }
  0x25   :  { %410 = dma.done.wait [#allocation6], 1024  }
  0x26   :  { %411 = vsyncadd [#allocation6], 4294966272  ;;  %v418_v0 = vmov 0.0|0.0   ;;  %vm419_vm0 = vmmov 0   ;;  %v420_v1 = vmov 0.0   ;;  %v42_v2 = vld [vmem:[#allocation5] sm:$0xff] }
  0x27   :  { %299 = vmatprep.subr.bf16.mxu0 %v418_v0  ;;  %285 = vmatprep.mubr.msk.f32.mxu0 %vm419_vm0, %v420_v1  ;;  %v43_v3 = vld [vmem:[#allocation5 + $0x8] sm:$0xff]  ;;  %v44_v4 = vld [vmem:[#allocation5 + $0x10] sm:$0xff]  ;;  %v45_v6 = vld [vmem:[#allocation5 + $0x18] sm:$0xff]  ;;  %s421_s1 = smov 32   ;;  %vm57_vm1 = vcmask 523264   ;;  %vm151_vm2 = vcmask 261120  }
  0x28   :  { %311 = vmatprep.subr.bf16.mxu1 %v418_v0  ;;  %296 = vmatprep.mubr.msk.f32.mxu1 %vm419_vm0, %v420_v1  ;;  %v300_v5 = vpack.c.bf16 %v43_v3, %v42_v2  ;;  %v328_v7 = vpack.i.bf16 %v43_v3, %v42_v2  ;;  %v303_v8 = vpack.c.bf16 %v45_v6, %v44_v4  ;;  %v252_v10 = vld [vmem:[%s495_s2] ss:$0 sm:$0xff]  ;;  %v46_v11 = vld [vmem:[#allocation5 + $0x20] sm:$0xff]  ;;  %v47_v12 = vld [vmem:[#allocation5 + $0x28] sm:$0xff]  ;;  %s422_s2 = smov 64   ;;  %s423_s12 = smov 96  }
  0x29   :  { %v333_v9 = vpack.i.bf16 %v45_v6, %v44_v4  ;;  %148 = vrot.lane.b32.xlu1 %v252_v10, %s421_s1  ;;  %v306_v13 = vpack.c.bf16 %v47_v12, %v46_v11  ;;  %v48_v14 = vld [vmem:[#allocation5 + $0x30] sm:$0xff]  ;;  %v49_v15 = vld [vmem:[#allocation5 + $0x38] sm:$0xff]  ;;  %s424_s13 = smov [#allocation7]  }
  0x2a   :  { %301 = vmatpush3.bf16.msra.mxu0 %v300_v5  ;;  %329 = vrot.lane.b32.xlu0 %v328_v7, %s421_s1  ;;  %v309_v16 = vpack.c.bf16 %v49_v15, %v48_v14  ;;  %v41_v17 = vld [vmem:[#allocation2] sm:$0xff]  ;;  %s242_s14 = sshll.u32 %s424_s13, 4  ;;  %s243_s14 = int_to_ptr.vmem [resolvable:$true] %s242_s14 }
  0x2b   :  { %302 = vmatprep.subr.bf16.mxu0 %v418_v0  ;;  %s386_s15 = scalar_lea.vmem %s243_s14, 128  ;;  %p391_p3 = scmp.lt.s32.totalorder %s243_s14, %s243_s14 }
  0x2c   :  { %p387_p2 = scmp.ne.s32.totalorder %s243_s14, %s386_s15  ;;  %p392_p4 = scmp.lt.s32.totalorder %s386_s15, %s386_s15 }
  0x2e   :  { %304 = vmatpush3.bf16.msra.mxu0 %v303_v8  ;;  %334 = vrot.lane.b32.xlu0 %v333_v9, %s421_s1  ;;  %p393_p5 = por %p392_p4, %p391_p3 }
  0x2f   :  { %305 = vmatprep.subr.bf16.mxu0 %v418_v0 }
  0x30   :  { %p394_p6 = pnand %p393_p5, %p387_p2 }
  0x32   :  { %307 = vmatpush3.bf16.msra.mxu0 %v306_v13 }
  0x33   :  { %308 = vmatprep.subr.bf16.mxu0 %v418_v0 }
  0x36   :  { %310 = vmatpush3.bf16.msra.mxu0 %v309_v16 }
  0x39   :  { %286 = vmatmul.mubr.msk.f32.vlgmr.msra.gmra.mrb[0].mxu0 %vm57_vm1, %v41_v17 }
  0x9b   :  { %v149_v30 = vpop.permute.xlu1 %148 }
  0x9c   :  { %v330_v18 = vpop.permute.xlu0 %329 }
  0x9d   :  { %v332_v19 = vunpack.i.h.bf16 %v330_v18  ;;  %v331_v20 = vunpack.i.l.bf16 %v330_v18 }
  0x9f   :  { %v312_v21 = vpack.c.bf16 %v332_v19, %v331_v20 }
  0xa0   :  { %v335_v22 = vpop.permute.xlu0 %334 }
  0xa1   :  { %v337_v23 = vunpack.i.h.bf16 %v335_v22  ;;  %v336_v24 = vunpack.i.l.bf16 %v335_v22  ;;  %313 = vmatpush3.bf16.msra.mxu1 %v312_v21 }
  0xa2   :  { %314 = vmatprep.subr.bf16.mxu1 %v418_v0 }
  0xa3   :  { %v315_v25 = vpack.c.bf16 %v337_v23, %v336_v24 }
  0xa5   :  { %316 = vmatpush3.bf16.msra.mxu1 %v315_v25 }
 0x10c   :  { %v127_v26 = vpop.f32.mrb[0].mxu0 }
 0x10d   :  { %v128_v27 = vadd.f32 %v252_v10, %v127_v26  ;;  %v287_v28 = vpop.f32.mrb[1].mxu0 }
 0x10f   :  { %338 = vtanh.f32 %v128_v27  ;;  %231 = vrot.lane.b32.xlu0 %v128_v27, %s422_s2 }
 0x119   :  { %v339_v29 = vpop.eup %338 }
 0x11a   :  { %226 = vrot.lane.b32.xlu1 %v339_v29, %s423_s12  ;;  %297 = vmatmul.mubr.msk.f32.vlgmr.msra.gmra.mrb[0].mxu1 %vm151_vm2, %v339_v29 }
 0x181   :  { %v232_v37 = vpop.permute.xlu0 %231 }
 0x18c   :  { %v227_v35 = vpop.permute.xlu1 %226 }
 0x1ed   :  { %v221_v31 = vpop.f32.mrb[0].mxu1 }
 0x1ee   :  { %v222_v32 = vadd.f32 %v221_v31, %v149_v30  ;;  %v298_v33 = vpop.f32.mrb[1].mxu1 }
 0x1f0   :  { %340 = vtanh.f32 %v222_v32 }
 0x1fa   :  { %v341_v34 = vpop.eup %340 }
 0x1fb   :  { %v229_v36 = vmul.f32 %v341_v34, %v227_v35 }
 0x1fd   :  { %v234_v38 = vadd.f32 %v232_v37, %v229_v36 }
 0x1ff   :  { %235 = vst.msk [vmem:[#allocation7] sm:$0xff] %vm151_vm2, %v234_v38 }
 0x200   :  { %397 = shalt.err (!%p394_p6)
}
 0x201   :  { %s398_s18 = scalar_lea.hbm %s496_s3, 128 }
 0x202   :  { %p399_p7 = scmp.ne.s32.totalorder %s496_s3, %s398_s18  ;;  %p402_p8 = scmp.lt.u32.totalorder %s398_s18, %s496_s3 }
 0x204   :  { %p404_p9 = pnand %p402_p8, %p399_p7 }
 0x206   :  { %407 = shalt.err (!%p404_p9)
}
 0x207   :  { %245 = dma.vmem_to_hbm [thread:$0]  %s243_s14, 128, %s496_s3, [#allocation4]  }
 0x208   :  { %412 = dma.done.wait [#allocation4], 128  }
 0x209   :  { %413 = vsyncadd [#allocation4], 4294967168 }
 0x20a   :  { %249 = vsyncpa [#allocation3], 1 }
 0x20b   :  { %250 = vsyncpa [#allocation6], 1 }
 0x20c   :  { %251 = vsyncpa [#allocation4], 1 }

</bundles_post_ra>
